<compile_context>
chip_gen: v6e
topology: v6e:2x2x1
jax: 0.10.0
libtpu: 0.0.40
codegen_flags: <defaults>
</compile_context>

<pallas_src>
from functools import partial

import numpy as np
import jax
import jax.numpy as jnp
from jax.experimental import pallas as pl
from jax.experimental.pallas import tpu as pltpu


_ROW_TILE = 256                      # pixel-row tile shared by both kernels
_VOX_TILE = 512                      # voxel-column tile of the BEV accumulator
_VMEM_LIMIT = 32 * 1024 * 1024       # explicit, safe on v5e/v6e/v7x


# --------------------------- config helpers (mirror PyTorch) -----------------
def gen_dx_bx(xbound, ybound, zbound):
    dx = np.array([row[2] for row in (xbound, ybound, zbound)], np.float32)
    bx = np.array([row[0] + row[2] / 2.0 for row in (xbound, ybound, zbound)],
                  np.float32)
    nx = np.array([(row[1] - row[0]) / row[2]
                   for row in (xbound, ybound, zbound)]).astype(np.int64)
    return dx, bx, nx


def depth_discretization(depth_min, depth_max, num_bins, mode):
    if mode == 'UD':
        bin_size = (depth_max - depth_min) / num_bins
        return depth_min + bin_size * np.arange(num_bins)
    elif mode == 'LID':
        bin_size = 2.0 * (depth_max - depth_min) / (num_bins * (1 + num_bins))
        i = np.arange(num_bins)
        return depth_min + bin_size * i * (i + 1) / 2.0
    raise NotImplementedError(mode)


# --------------------------- Pallas kernel 1: fused cam encode ---------------
def _cam_encode_kernel(patch_ref, w_ref, b_ref, out_ref, *, D):
    x = patch_ref[...]                                               # (TM, K)
    # single fused MXU pass producing [depth logits | image features]
    y = jnp.dot(x, w_ref[...], preferred_element_type=jnp.float32) + b_ref[...]
    # masked softmax over the first D lanes of the fused (D + C) slab
    col = jax.lax.broadcasted_iota(jnp.int32, y.shape, 1)
    is_depth = col < D
    neg = jnp.float32(-1e30)
    dmax = jnp.max(jnp.where(is_depth, y, neg), axis=-1, keepdims=True)
    e = jnp.exp(jnp.where(is_depth, y - dmax, neg))                  # 0 on feat lanes
    inv = pl.reciprocal(jnp.sum(e, axis=-1, keepdims=True), approx=True)
    out_ref[...] = jnp.where(is_depth, e * inv, y)


def cam_encode_pallas(patches, w, b, D):
    Npad, K = patches.shape
    DC = w.shape[1]
    TM = _ROW_TILE
    assert Npad % TM == 0
    flops = 2 * Npad * K * DC + 8 * Npad * DC
    bytes_acc = 4 * (Npad * K + K * DC + DC + Npad * DC)
    return pl.pallas_call(
        partial(_cam_encode_kernel, D=D),
        out_shape=jax.ShapeDtypeStruct((Npad, DC), jnp.float32),
        grid=(Npad // TM,),
        in_specs=[pl.BlockSpec((TM, K), lambda i: (i, 0)),
                  pl.BlockSpec((K, DC), lambda i: (0, 0)),
                  pl.BlockSpec((1, DC), lambda i: (0, 0))],
        out_specs=pl.BlockSpec((TM, DC), lambda i: (i, 0)),
        compiler_params=pltpu.CompilerParams(
            dimension_semantics=("parallel",),
            vmem_limit_bytes=_VMEM_LIMIT),
        cost_estimate=pl.CostEstimate(flops=flops,
                                      transcendentals=Npad * DC,
                                      bytes_accessed=bytes_acc),
    )(patches, w, b)


def cam_encode_ref(patches, w, b, D):
    y = jnp.dot(patches, w, precision=jax.lax.Precision.HIGHEST) + b
    depth = jax.nn.softmax(y[:, :D], axis=-1)
    return jnp.concatenate([depth, y[:, D:]], axis=-1)


# --------------------------- Pallas kernel 2: fused lift + voxel pool --------
def _voxel_pool_kernel(idx_ref, depth_ref, featT_ref, out_ref, *, D, TV):
    @pl.when(pl.program_id(1) == 0)
    def _():
        out_ref[...] = jnp.zeros_like(out_ref)

    idx = idx_ref[...]                                               # (TP, D) int32
    depth = depth_ref[...]                                           # (TP, D) f32
    tp = idx.shape[0]
    # voxel ids covered by this voxel block (one cheap hardware iota per step)
    lane = jax.lax.broadcasted_iota(jnp.int32, (tp, TV), 1) + pl.program_id(0) * TV
    # depth-weighted scatter matrix: the "lift" (depth x feat outer product) is
    # fused here, so the (Npts, C) lifted tensor never touches HBM and the MXU
    # contraction runs over pixels (D x fewer rows than lifted points).
    wmat = jnp.zeros((tp, TV), jnp.float32)
    for d in range(D):                                               # D is static
        wmat = wmat + jnp.where(lane == idx[:, d:d + 1],
                                depth[:, d:d + 1], jnp.float32(0.0))
    # bev[c, v] += featT[c, p] @ W[p, v] : bf16 MXU, f32 lane-dense accumulator
    out_ref[...] += jnp.dot(featT_ref[...], wmat.astype(jnp.bfloat16),
                            preferred_element_type=jnp.float32)


def voxel_pool_pallas(vox_idx, depth, featT, nvox):
    Npad, D = vox_idx.shape
    C = featT.shape[0]
    TP = _ROW_TILE
    assert Npad % TP == 0
    TV = min(_VOX_TILE, int(pl.next_power_of_2(nvox)))
    nvox_pad = int(pl.cdiv(nvox, TV)) * TV
    grid = (nvox_pad // TV, Npad // TP)
    flops = 2 * C * Npad * nvox_pad + 3 * D * Npad * nvox_pad
    bytes_acc = 4 * (2 * Npad * D + C * nvox_pad) + 2 * C * Npad
    out = pl.pallas_call(
        partial(_voxel_pool_kernel, D=D, TV=TV),
        out_shape=jax.ShapeDtypeStruct((C, nvox_pad), jnp.float32),
        grid=grid,
        in_specs=[pl.BlockSpec((TP, D), lambda j, i: (i, 0)),
                  pl.BlockSpec((TP, D), lambda j, i: (i, 0)),
                  pl.BlockSpec((C, TP), lambda j, i: (0, i))],
        out_specs=pl.BlockSpec((C, TV), lambda j, i: (0, j)),
        compiler_params=pltpu.CompilerParams(
            dimension_semantics=("parallel", "arbitrary"),
            vmem_limit_bytes=_VMEM_LIMIT),
        cost_estimate=pl.CostEstimate(flops=flops, transcendentals=0,
                                      bytes_accessed=bytes_acc),
    )(vox_idx, depth.astype(jnp.float32), featT.astype(jnp.bfloat16))
    return out[:, :nvox]


def voxel_pool_ref(vox_idx, depth, featT, nvox):
    Npad, D = vox_idx.shape
    C = featT.shape[0]
    feat = featT.astype(jnp.float32).T                               # (Npad, C)
    lifted = (depth[:, :, None] * feat[:, None, :]).reshape(Npad * D, C)
    seg = vox_idx.reshape(-1)
    seg = jnp.where(seg >= 0, seg, nvox)                             # -1 = dropped
    pooled = jax.ops.segment_sum(lifted, seg, num_segments=nvox + 1)[:nvox]
    return pooled.T                                                  # (C, nvox)


# --------------------------- model ------------------------------------------
class LiftSplatShootPallas:
    def __init__(self, args, in_channels=3):
        self.grid_conf = args['grid_conf']
        self.data_aug_conf = args['data_aug_conf']
        dx, bx, nx = gen_dx_bx(self.grid_conf['xbound'],
                               self.grid_conf['ybound'],
                               self.grid_conf['zbound'])
        self.dx = jnp.asarray(dx)
        self.bx = jnp.asarray(bx)
        self.nx = nx
        self.depth_supervision = args['depth_supervision']
        self.downsample = args['img_downsample']
        self.camC = args['img_features']
        self.frustum = self.create_frustum()
        self.D = self.frustum.shape[0]
        # deterministic synthetic depthnet weights (stand-in for CamEncode),
        # fused into a single (K, D + camC) matmul.
        Kin = in_channels * self.downsample * self.downsample
        kd, kf = jax.random.split(jax.random.PRNGKey(0))
        wd = 0.1 * jax.random.normal(kd, (Kin, self.D))
        wf = 0.1 * jax.random.normal(kf, (Kin, self.camC))
        bd = jnp.linspace(-0.1, 0.1, self.D)
        bf = jnp.linspace(-0.2, 0.2, self.camC)
        self.w = jnp.concatenate([wd, wf], axis=1).astype(jnp.float32)
        self.b = jnp.concatenate([bd, bf]).reshape(1, self.D + self.camC
                                                   ).astype(jnp.float32)

    def create_frustum(self):
        ogfH, ogfW = self.data_aug_conf['final_dim']
        fH, fW = ogfH // self.downsample, ogfW // self.downsample
        ds = np.asarray(depth_discretization(*self.grid_conf['ddiscr'],
                                             self.grid_conf['mode']), np.float32)
        D = ds.shape[0]
        ds = np.broadcast_to(ds.reshape(-1, 1, 1), (D, fH, fW))
        xs = np.broadcast_to(np.linspace(0, ogfW - 1, fW, dtype=np.float32
                                         ).reshape(1, 1, fW), (D, fH, fW))
        ys = np.broadcast_to(np.linspace(0, ogfH - 1, fH, dtype=np.float32
                                         ).reshape(1, fH, 1), (D, fH, fW))
        return jnp.asarray(np.stack((xs, ys, ds), -1))               # (D, fH, fW, 3)

    def get_geometry(self, rots, trans, intrins, post_rots, post_trans):
        points = self.frustum[None, None] - post_trans[:, :, None, None, None, :]
        inv_post = jnp.linalg.inv(post_rots)
        points = jnp.einsum('bnij,bndhwj->bndhwi', inv_post, points)
        points = jnp.concatenate([points[..., :2] * points[..., 2:3],
                                  points[..., 2:3]], axis=-1)
        combine = rots @ jnp.linalg.inv(intrins)
        points = jnp.einsum('bnij,bndhwj->bndhwi', combine, points)
        points = points + trans[:, :, None, None, None, :]
        return points                                                # (B,N,D,fH,fW,3)

    def forward(self, data_dict, modality_name, use_reference=False):
        d = data_dict[f'inputs_{modality_name}']
        x, rots, trans = d['imgs'], d['rots'], d['trans']
        intrins, post_rots, post_trans = d['intrins'], d['post_rots'], d['post_trans']
        encode_fn = cam_encode_ref if use_reference else cam_encode_pallas
        pool_fn = voxel_pool_ref if use_reference else voxel_pool_pallas

        B, N, Cin, imH, imW = x.shape
        ds = self.downsample
        fH, fW = imH // ds, imW // ds
        D, C = self.D, self.camC
        Npix = B * N * fH * fW
        Npad = int(pl.cdiv(Npix, _ROW_TILE)) * _ROW_TILE

        # im2col of ds x ds patches (synthetic trunk; see TODO(synk) above)
        p = x.reshape(B * N, Cin, fH, ds, fW, ds)
        p = p.transpose(0, 2, 4, 1, 3, 5).reshape(Npix, Cin * ds * ds)
        p = jnp.pad(p, ((0, Npad - Npix), (0, 0)))

        dfeat = encode_fn(p, self.w, self.b, D)                      # (Npad, D+C)

        # geometry -> voxel row index per (pixel, depth bin), -1 = dropped
        geom = self.get_geometry(rots, trans, intrins, post_rots, post_trans)
        geom = jnp.transpose(geom, (0, 1, 3, 4, 2, 5)).reshape(Npix, D, 3)
        X, Y, Z = int(self.nx[0]), int(self.nx[1]), int(self.nx[2])
        # torch .long() truncates toward zero -> astype(int32) matches exactly
        g = ((geom - (self.bx - self.dx / 2.0)) / self.dx).astype(jnp.int32)
        kept = ((g[..., 0] >= 0) & (g[..., 0] < X) &
                (g[..., 1] >= 0) & (g[..., 1] < Y) &
                (g[..., 2] >= 0) & (g[..., 2] < Z))
        batch_ix = (jnp.arange(Npix, dtype=jnp.int32) // (N * fH * fW))[:, None]
        row = (batch_ix * (Z * Y * X) + g[..., 2] * (Y * X)
               + g[..., 1] * X + g[..., 0])
        row = jnp.where(kept, row, -1).astype(jnp.int32)
        row = jnp.pad(row, ((0, Npad - Npix), (0, 0)), constant_values=-1)

        depth = dfeat[:, :D]                                         # (Npad, D)
        featT = jnp.transpose(dfeat[:, D:])                          # (C, Npad)

        nvox = B * Z * Y * X
        pooled = pool_fn(row, depth, featT, nvox)                    # (C, B*Z*Y*X)

        # (C,B,Z,Y,X) -> (B,Z,C,Y,X) -> (B, Z*C, Y, X); matches
        # torch.cat(final.unbind(dim=2), 1) with channel index z*C + c.
        final = pooled.reshape(C, B, Z, Y, X)
        final = jnp.transpose(final, (1, 2, 0, 3, 4)).reshape(B, Z * C, Y, X)

        if self.depth_supervision:
            self.depth_items = depth[:Npix].reshape(B, N, fH, fW, D)
        return final


# --------------------------- demo -------------------------------------------
if __name__ == "__main__":
    args = {
        'grid_conf': {'xbound': [-8.0, 8.0, 1.0],
                      'ybound': [-8.0, 8.0, 1.0],
                      'zbound': [-8.0, 8.0, 8.0],
                      'ddiscr': [2.0, 10.0, 4],
                      'mode': 'UD'},
        'data_aug_conf': {'final_dim': (32, 32)},
        'img_downsample': 4,
        'img_features': 8,
        'depth_supervision': False,
        'use_depth_gt': False,
        'camera_encoder': 'EfficientNet',
    }
    B, N, Cin = 2, 1, 3
    imH, imW = args['data_aug_conf']['final_dim']

    model = LiftSplatShootPallas(args, in_channels=Cin)

    key = jax.random.PRNGKey(0)
    k1, k2 = jax.random.split(key)
    imgs = jax.random.normal(k1, (B, N, Cin, imH, imW), jnp.float32)
    # camera-to-ego rotation (cam z -> ego x, cam x -> -ego y, cam y -> -ego z)
    R = jnp.array([[0., 0., 1.], [-1., 0., 0.], [0., -1., 0.]], jnp.float32)
    rots = jnp.broadcast_to(R, (B, N, 3, 3))
    trans = 0.5 * jax.random.normal(k2, (B, N, 3), jnp.float32)
    Kmat = jnp.array([[20., 0., 16.], [0., 20., 16.], [0., 0., 1.]], jnp.float32)
    intrins = jnp.broadcast_to(Kmat, (B, N, 3, 3))
    post_rots = jnp.broadcast_to(jnp.eye(3, dtype=jnp.float32), (B, N, 3, 3))
    post_trans = jnp.zeros((B, N, 3), jnp.float32)

    data_dict = {'inputs_cam': {'imgs': imgs, 'rots': rots, 'trans': trans,
                                'intrins': intrins, 'post_rots': post_rots,
                                'post_trans': post_trans}}

    out = jax.block_until_ready(model.forward(data_dict, 'cam'))
    ref = jax.block_until_ready(model.forward(data_dict, 'cam', use_reference=True))

    Z, Y, X = int(model.nx[2]), int(model.nx[1]), int(model.nx[0])
    assert out.shape == (B, Z * model.camC, Y, X), out.shape
    assert bool(jnp.all(jnp.isfinite(out)))
    assert bool(jnp.allclose(out, ref, rtol=5e-2, atol=5e-2))
    print("KERNEL_OK")
</pallas_src>

<mosaic_0001>
module attributes {stable_mosaic.version = 11 : i64} {
  func.func @_cam_encode_kernel(%arg0: i32, %arg1: memref<256x48xf32, #tpu.memory_space<vmem>>, %arg2: memref<48x12xf32, #tpu.memory_space<vmem>>, %arg3: memref<1x12xf32, #tpu.memory_space<vmem>>, %arg4: memref<256x12xf32, #tpu.memory_space<vmem>>) attributes {dimension_semantics = [#tpu.dimension_semantics<parallel>], iteration_bounds = array<i64: 1>, scalar_prefetch = 0 : i64, scratch_operands = 0 : i64, tpu.core_type = #tpu.core_type<tc>, window_params = [{transform_indices = @transform_0, window_bounds = array<i64: 256, 48>}, {pipeline_mode = #tpu.pipeline_mode<synchronous>, transform_indices = @transform_1, window_bounds = array<i64: 48, 12>}, {pipeline_mode = #tpu.pipeline_mode<synchronous>, transform_indices = @transform_2, window_bounds = array<i64: 1, 12>}, {transform_indices = @transform_3, window_bounds = array<i64: 256, 12>}]} {
    %c0 = arith.constant 0 : index
    %c0_0 = arith.constant 0 : index
    %0 = vector.load %arg1[%c0, %c0_0] : memref<256x48xf32, #tpu.memory_space<vmem>>, vector<256x48xf32>
    %c0_1 = arith.constant 0 : index
    %c0_2 = arith.constant 0 : index
    %1 = vector.load %arg2[%c0_1, %c0_2] : memref<48x12xf32, #tpu.memory_space<vmem>>, vector<48x12xf32>
    %cst = arith.constant dense<0.000000e+00> : vector<256x12xf32>
    %2 = tpu.matmul %0, %1, %cst {dimension_numbers = #tpu.dot_dimension_numbers<[1], [0], [0], [1], [0, 0, 1, 1], [], []>} : vector<256x48xf32>, vector<48x12xf32>, vector<256x12xf32> -> vector<256x12xf32>
    %c0_3 = arith.constant 0 : index
    %c0_4 = arith.constant 0 : index
    %3 = vector.load %arg3[%c0_3, %c0_4] : memref<1x12xf32, #tpu.memory_space<vmem>>, vector<1x12xf32>
    %4 = vector.broadcast %3 : vector<1x12xf32> to vector<256x12xf32>
    %5 = arith.addf %2, %4 : vector<256x12xf32>
    %6 = tpu.iota {dimensions = array<i32: 1>} : vector<256x12xi32>
    %c4_i32 = arith.constant 4 : i32
    %7 = vector.broadcast %c4_i32 : i32 to vector<256x12xi32>
    %8 = arith.cmpi slt, %6, %7 : vector<256x12xi32>
    %cst_5 = arith.constant -1.000000e+30 : f32
    %9 = vector.broadcast %cst_5 : f32 to vector<256x12xf32>
    %10 = arith.select %8, %5, %9 : vector<256x12xi1>, vector<256x12xf32>
    %cst_6 = arith.constant dense<0xFF800000> : vector<256xf32>
    %11 = vector.multi_reduction <maximumf>, %10, %cst_6 [1] : vector<256x12xf32> to vector<256xf32>
    %12 = vector.shape_cast %11 : vector<256xf32> to vector<256x1xf32>
    %13 = vector.broadcast %12 : vector<256x1xf32> to vector<256x12xf32>
    %14 = arith.subf %5, %13 : vector<256x12xf32>
    %cst_7 = arith.constant -1.000000e+30 : f32
    %15 = vector.broadcast %cst_7 : f32 to vector<256x12xf32>
    %16 = arith.select %8, %14, %15 : vector<256x12xi1>, vector<256x12xf32>
    %17 = math.exp %16 : vector<256x12xf32>
    %cst_8 = arith.constant dense<0.000000e+00> : vector<256xf32>
    %18 = vector.multi_reduction <add>, %17, %cst_8 [1] : vector<256x12xf32> to vector<256xf32>
    %19 = vector.shape_cast %18 : vector<256xf32> to vector<256x1xf32>
    %20 = tpu.reciprocal %19 {approx = true} : vector<256x1xf32> -> vector<256x1xf32>
    %21 = vector.broadcast %20 : vector<256x1xf32> to vector<256x12xf32>
    %22 = arith.mulf %17, %21 : vector<256x12xf32>
    %23 = arith.select %8, %22, %5 : vector<256x12xi1>, vector<256x12xf32>
    %c0_9 = arith.constant 0 : index
    %c0_10 = arith.constant 0 : index
    %24 = vector.load %arg4[%c0_9, %c0_10] : memref<256x12xf32, #tpu.memory_space<vmem>>, vector<256x12xf32>
    tpu.vector_store %arg4[%c0_9, %c0_10], %23 {strides = array<i32>} : memref<256x12xf32, #tpu.memory_space<vmem>>, vector<256x12xf32>,
    return
  }
  func.func @transform_0(%arg0: i32) -> (i32, i32) {
    %c0_i32 = arith.constant 0 : i32
    %c0_i32_0 = arith.constant 0 : i32
    return %arg0, %c0_i32 : i32, i32
  }
  func.func @transform_1(%arg0: i32) -> (i32, i32) {
    %c0_i32 = arith.constant 0 : i32
    %c0_i32_0 = arith.constant 0 : i32
    %c0_i32_1 = arith.constant 0 : i32
    return %c0_i32, %c0_i32_0 : i32, i32
  }
  func.func @transform_2(%arg0: i32) -> (i32, i32) {
    %c0_i32 = arith.constant 0 : i32
    %c0_i32_0 = arith.constant 0 : i32
    %c0_i32_1 = arith.constant 0 : i32
    return %c0_i32, %c0_i32_0 : i32, i32
  }
  func.func @transform_3(%arg0: i32) -> (i32, i32) {
    %c0_i32 = arith.constant 0 : i32
    %c0_i32_0 = arith.constant 0 : i32
    return %arg0, %c0_i32 : i32, i32
  }
}

</mosaic_0001>

<bundles_post_ra>
// kernel: tpu_custom_call.1
= control target key start
LH: loop header
LB: loop body
LE: loop exit
PB: predicated region body
PF: predicated region fallthrough
CT: control target
= control target key end

     0   :  { %vm59_vm0 = vcmask 392192   ;;  %v381_v38 = vlaneseq  ;;  %vm416_vm2 = vcmask 97280   ;;  %s2018_s1 = inlined_call_operand.vmem [shape: f32[48,12], index: 1, kind: input, shape index: {}]   ;;  %s2019_s0 = inlined_call_operand.vmem [shape: f32[256,48], index: 0, kind: input, shape index: {}]   ;;  %s2020_s2 = inlined_call_operand.vmem [shape: f32[1,12], index: 2, kind: input, shape index: {}]   ;;  %s2021_s3 = inlined_call_operand.vmem [shape: f32[256,12], index: 3, kind: output, shape index: {}]  }
   0x1   :  { %v51_v0 = vld [vmem:[%s2018_s1 + $0x28] sm:$0xff]  ;;  %v50_v1 = vld [vmem:[%s2018_s1 + $0x20] sm:$0xff]  ;;  %v49_v2 = vld [vmem:[%s2018_s1 + $0x18] sm:$0xff] }
   0x2   :  { %940 = vmatprep.subr.mxu0 %v51_v0  ;;  %1000 = vmatprep.subr.mxu1 %v51_v0  ;;  %v48_v3 = vld [vmem:[%s2018_s1 + $0x10] sm:$0xff]  ;;  %v47_v4 = vld [vmem:[%s2018_s1 + $0x8] sm:$0xff]  ;;  %v46_v5 = vld [vmem:[%s2018_s1] sm:$0xff]  ;;  %v1306_v39 = vand.u32 127, %v381_v38 }
   0x3   :  { %941 = vmatpush3.msra.mxu0 %v51_v0  ;;  %1006 = vmatpush3.msra.mxu1 %v51_v0  ;;  %v14_v6 = vld [vmem:[%s2019_s0] sm:$0xff]  ;;  %v15_v8 = vld [vmem:[%s2019_s0 + $0x8] sm:$0xff]  ;;  %v16_v10 = vld [vmem:[%s2019_s0 + $0x10] sm:$0xff] }
   0x4   :  { %942 = vmatprep.subr.mxu0 %v50_v1  ;;  %1001 = vmatprep.subr.mxu1 %v50_v1  ;;  %v30_v7 = vld [vmem:[%s2019_s0 + $0x80] sm:$0xff]  ;;  %v31_v9 = vld [vmem:[%s2019_s0 + $0x88] sm:$0xff]  ;;  %v32_v11 = vld [vmem:[%s2019_s0 + $0x90] sm:$0xff]  ;;  %vm383_vm1 = vcmp.lt.s32.totalorder %v1306_v39, 4 }
   0x5   :  { %943 = vmatpush3.msra.mxu0 %v50_v1  ;;  %1007 = vmatpush3.msra.mxu1 %v50_v1  ;;  %v17_v12 = vld [vmem:[%s2019_s0 + $0x18] sm:$0xff]  ;;  %v18_v14 = vld [vmem:[%s2019_s0 + $0x20] sm:$0xff]  ;;  %v19_v16 = vld [vmem:[%s2019_s0 + $0x28] sm:$0xff] }
   0x6   :  { %944 = vmatprep.subr.mxu0 %v49_v2  ;;  %1002 = vmatprep.subr.mxu1 %v49_v2  ;;  %v33_v13 = vld [vmem:[%s2019_s0 + $0x98] sm:$0xff]  ;;  %v34_v15 = vld [vmem:[%s2019_s0 + $0xa0] sm:$0xff]  ;;  %v35_v17 = vld [vmem:[%s2019_s0 + $0xa8] sm:$0xff] }
   0x7   :  { %945 = vmatpush3.msra.mxu0 %v49_v2  ;;  %1008 = vmatpush3.msra.mxu1 %v49_v2  ;;  %v20_v18 = vld [vmem:[%s2019_s0 + $0x30] sm:$0xff]  ;;  %v21_v20 = vld [vmem:[%s2019_s0 + $0x38] sm:$0xff]  ;;  %v22_v22 = vld [vmem:[%s2019_s0 + $0x40] sm:$0xff] }
   0x8   :  { %946 = vmatprep.subr.mxu0 %v48_v3  ;;  %1003 = vmatprep.subr.mxu1 %v48_v3  ;;  %v36_v19 = vld [vmem:[%s2019_s0 + $0xb0] sm:$0xff]  ;;  %v37_v21 = vld [vmem:[%s2019_s0 + $0xb8] sm:$0xff]  ;;  %v38_v23 = vld [vmem:[%s2019_s0 + $0xc0] sm:$0xff] }
   0x9   :  { %947 = vmatpush3.msra.mxu0 %v48_v3  ;;  %1009 = vmatpush3.msra.mxu1 %v48_v3  ;;  %v23_v24 = vld [vmem:[%s2019_s0 + $0x48] sm:$0xff]  ;;  %v24_v26 = vld [vmem:[%s2019_s0 + $0x50] sm:$0xff]  ;;  %v25_v28 = vld [vmem:[%s2019_s0 + $0x58] sm:$0xff] }
   0xa   :  { %948 = vmatprep.subr.mxu0 %v47_v4  ;;  %1004 = vmatprep.subr.mxu1 %v47_v4  ;;  %v39_v25 = vld [vmem:[%s2019_s0 + $0xc8] sm:$0xff]  ;;  %v40_v27 = vld [vmem:[%s2019_s0 + $0xd0] sm:$0xff]  ;;  %v41_v29 = vld [vmem:[%s2019_s0 + $0xd8] sm:$0xff] }
   0xb   :  { %949 = vmatpush3.msra.mxu0 %v47_v4  ;;  %1010 = vmatpush3.msra.mxu1 %v47_v4  ;;  %v26_v30 = vld [vmem:[%s2019_s0 + $0x60] sm:$0xff]  ;;  %v27_v32 = vld [vmem:[%s2019_s0 + $0x68] sm:$0xff]  ;;  %v28_v34 = vld [vmem:[%s2019_s0 + $0x70] sm:$0xff] }
   0xc   :  { %950 = vmatprep.subr.mxu0 %v46_v5  ;;  %1005 = vmatprep.subr.mxu1 %v46_v5  ;;  %v42_v31 = vld [vmem:[%s2019_s0 + $0xe0] sm:$0xff]  ;;  %v43_v33 = vld [vmem:[%s2019_s0 + $0xe8] sm:$0xff]  ;;  %v44_v35 = vld [vmem:[%s2019_s0 + $0xf0] sm:$0xff] }
   0xd   :  { %951 = vmatpush3.msra.mxu0 %v46_v5  ;;  %1011 = vmatpush3.msra.mxu1 %v46_v5  ;;  %v29_v36 = vld [vmem:[%s2019_s0 + $0x78] sm:$0xff]  ;;  %v1311_v40 = vld [vmem:[%s2020_s2] ss:$0 sm:$0xff] }
   0xe   :  { %952 = vmatprep.mubr.msk.f32.mxu0 %vm59_vm0, %v14_v6  ;;  %976 = vmatprep.mubr.msk.f32.mxu1 %vm59_vm0, %v30_v7  ;;  %v45_v37 = vld [vmem:[%s2019_s0 + $0xf8] sm:$0xff] }
   0xf   :  { %953 = vmatmul.mubr.msk.f32.vlgmr.msra.gmra.mxu0 %vm59_vm0, %v15_v8  ;;  %977 = vmatmul.mubr.msk.f32.vlgmr.msra.gmra.mxu1 %vm59_vm0, %v31_v9 }
  0x10   :  { %955 = vmatprep.mubr.msk.f32.mxu0 %vm59_vm0, %v16_v10  ;;  %979 = vmatprep.mubr.msk.f32.mxu1 %vm59_vm0, %v32_v11 }
  0x13   :  { %956 = vmatmul.mubr.msk.f32.gmra.mxu0 %vm59_vm0, %v17_v12  ;;  %980 = vmatmul.mubr.msk.f32.gmra.mxu1 %vm59_vm0, %v33_v13 }
  0x14   :  { %958 = vmatprep.mubr.msk.f32.mxu0 %vm59_vm0, %v18_v14  ;;  %982 = vmatprep.mubr.msk.f32.mxu1 %vm59_vm0, %v34_v15 }
  0x17   :  { %959 = vmatmul.mubr.msk.f32.gmra.mxu0 %vm59_vm0, %v19_v16  ;;  %983 = vmatmul.mubr.msk.f32.gmra.mxu1 %vm59_vm0, %v35_v17 }
  0x18   :  { %961 = vmatprep.mubr.msk.f32.mxu0 %vm59_vm0, %v20_v18  ;;  %985 = vmatprep.mubr.msk.f32.mxu1 %vm59_vm0, %v36_v19 }
  0x1b   :  { %962 = vmatmul.mubr.msk.f32.gmra.mxu0 %vm59_vm0, %v21_v20  ;;  %986 = vmatmul.mubr.msk.f32.gmra.mxu1 %vm59_vm0, %v37_v21 }
  0x1c   :  { %964 = vmatprep.mubr.msk.f32.mxu0 %vm59_vm0, %v22_v22  ;;  %988 = vmatprep.mubr.msk.f32.mxu1 %vm59_vm0, %v38_v23 }
  0x1f   :  { %965 = vmatmul.mubr.msk.f32.gmra.mxu0 %vm59_vm0, %v23_v24  ;;  %989 = vmatmul.mubr.msk.f32.gmra.mxu1 %vm59_vm0, %v39_v25 }
  0x20   :  { %967 = vmatprep.mubr.msk.f32.mxu0 %vm59_vm0, %v24_v26  ;;  %991 = vmatprep.mubr.msk.f32.mxu1 %vm59_vm0, %v40_v27 }
  0x23   :  { %968 = vmatmul.mubr.msk.f32.gmra.mxu0 %vm59_vm0, %v25_v28  ;;  %992 = vmatmul.mubr.msk.f32.gmra.mxu1 %vm59_vm0, %v41_v29 }
  0x24   :  { %970 = vmatprep.mubr.msk.f32.mxu0 %vm59_vm0, %v26_v30  ;;  %994 = vmatprep.mubr.msk.f32.mxu1 %vm59_vm0, %v42_v31 }
  0x27   :  { %971 = vmatmul.mubr.msk.f32.gmra.mxu0 %vm59_vm0, %v27_v32  ;;  %995 = vmatmul.mubr.msk.f32.gmra.mxu1 %vm59_vm0, %v43_v33 }
  0x28   :  { %973 = vmatprep.mubr.msk.f32.mxu0 %vm59_vm0, %v28_v34  ;;  %997 = vmatprep.mubr.msk.f32.mxu1 %vm59_vm0, %v44_v35 }
  0x2b   :  { %974 = vmatmul.mubr.msk.f32.gmra.mxu0 %vm59_vm0, %v29_v36  ;;  %998 = vmatmul.mubr.msk.f32.gmra.mxu1 %vm59_vm0, %v45_v37 }
  0xcf   :  { %v954_v41 = vpop.f32.mrf.mxu0  ;;  %v978_v42 = vpop.f32.mrf.mxu1 }
  0xd0   :  { %v1315_v43 = vadd.f32 %v954_v41, %v1311_v40  ;;  %v1318_v44 = vadd.f32 %v978_v42, %v1311_v40 }
  0xd1   :  { %v222_v45 = vpop.f32.mrf.mxu0  ;;  %v302_v46 = vpop.f32.mrf.mxu1 }
  0xd2   :  { %v1321_v47 = vadd.f32 %v1311_v40, %v222_v45  ;;  %v401_v48 = vsel %vm383_vm1, %v1318_v44, -1e+30  ;;  %v385_v49 = vsel %vm383_vm1, %v1315_v43, -1e+30  ;;  %v1332_v54 = vadd.f32 %v1311_v40, %v302_v46 }
  0xd3   :  { %v957_v50 = vpop.f32.mrf.mxu0  ;;  %v468_v51 = vsel %vm416_vm2, %v401_v48, -inf  ;;  %v420_v52 = vsel %vm416_vm2, %v385_v49, -inf  ;;  %v981_v53 = vpop.f32.mrf.mxu1 }
  0xd4   :  { %v1335_v55 = vadd.f32 %v957_v50, %v1311_v40  ;;  %469 = vmax.xlane.f32.xlu1 %v468_v51  ;;  %421 = vmax.xlane.f32.xlu0 %v420_v52  ;;  %v1338_v56 = vadd.f32 %v981_v53, %v1311_v40  ;;  %v384_v57 = vsel %vm383_vm1, %v1321_v47, -1e+30  ;;  %v400_v4 = vsel %vm383_vm1, %v1332_v54, -1e+30 }
  0xd5   :  { %v232_v58 = vpop.f32.mrf.mxu0  ;;  %v312_v59 = vpop.f32.mrf.mxu1  ;;  %v417_v63 = vsel %vm416_vm2, %v384_v57, -inf  ;;  %v465_v9 = vsel %vm416_vm2, %v400_v4, -inf }
  0xd6   :  { %v387_v60 = vsel %vm383_vm1, %v1335_v55, -1e+30  ;;  %v403_v61 = vsel %vm383_vm1, %v1338_v56, -1e+30  ;;  %v1352_v2 = vadd.f32 %v1311_v40, %v232_v58  ;;  %v1355_v3 = vadd.f32 %v1311_v40, %v312_v59 }
  0xd7   :  { %v426_v62 = vsel %vm416_vm2, %v387_v60, -inf  ;;  %v960_v0 = vpop.f32.mrf.mxu0  ;;  %v984_v1 = vpop.f32.mrf.mxu1  ;;  %v474_v5 = vsel %vm416_vm2, %v403_v61, -inf }
  0xd8   :  { %427 = vmax.xlane.f32.xlu1 %v426_v62  ;;  %418 = vmax.xlane.f32.xlu0 %v417_v63  ;;  %v1362_v7 = vadd.f32 %v960_v0, %v1311_v40  ;;  %v386_v12 = vsel %vm383_vm1, %v1352_v2, -1e+30  ;;  %v402_v13 = vsel %vm383_vm1, %v1355_v3, -1e+30  ;;  %v1375_v14 = vadd.f32 %v984_v1, %v1311_v40 }
  0xd9   :  { %v242_v6 = vpop.f32.mrf.mxu0  ;;  %v322_v10 = vpop.f32.mrf.mxu1  ;;  %v423_v18 = vsel %vm416_vm2, %v386_v12, -inf  ;;  %v471_v19 = vsel %vm416_vm2, %v402_v13, -inf }
  0xda   :  { %v1365_v8 = vadd.f32 %v1311_v40, %v242_v6  ;;  %v1378_v15 = vadd.f32 %v1311_v40, %v322_v10  ;;  %v389_v16 = vsel %vm383_vm1, %v1362_v7, -1e+30  ;;  %v405_v26 = vsel %vm383_vm1, %v1375_v14, -1e+30 }
  0xdb   :  { %v963_v11 = vpop.f32.mrf.mxu0  ;;  %v987_v21 = vpop.f32.mrf.mxu1  ;;  %v432_v22 = vsel %vm416_vm2, %v389_v16, -inf  ;;  %v480_v30 = vsel %vm416_vm2, %v405_v26, -inf }
  0xdc   :  { %475 = vmax.xlane.f32.xlu1 %v474_v5  ;;  %466 = vmax.xlane.f32.xlu0 %v465_v9  ;;  %v388_v17 = vsel %vm383_vm1, %v1365_v8, -1e+30  ;;  %v1391_v24 = vadd.f32 %v963_v11, %v1311_v40  ;;  %v404_v27 = vsel %vm383_vm1, %v1378_v15, -1e+30  ;;  %v1405_v32 = vadd.f32 %v987_v21, %v1311_v40 }
  0xdd   :  { %v252_v20 = vpop.f32.mrf.mxu0  ;;  %v429_v23 = vsel %vm416_vm2, %v388_v17, -inf  ;;  %v332_v28 = vpop.f32.mrf.mxu1  ;;  %v477_v31 = vsel %vm416_vm2, %v404_v27, -inf }
  0xde   :  { %v1394_v25 = vadd.f32 %v1311_v40, %v252_v20  ;;  %v1408_v33 = vadd.f32 %v1311_v40, %v332_v28  ;;  %v391_v34 = vsel %vm383_vm1, %v1391_v24, -1e+30  ;;  %v407_v46 = vsel %vm383_vm1, %v1405_v32, -1e+30 }
  0xdf   :  { %v966_v29 = vpop.f32.mrf.mxu0  ;;  %v990_v37 = vpop.f32.mrf.mxu1  ;;  %v438_v38 = vsel %vm416_vm2, %v391_v34, -inf  ;;  %v486_v51 = vsel %vm416_vm2, %v407_v46, -inf }
  0xe0   :  { %424 = vmax.xlane.f32.xlu1 %v423_v18  ;;  %472 = vmax.xlane.f32.xlu0 %v471_v19  ;;  %v390_v35 = vsel %vm383_vm1, %v1394_v25, -1e+30  ;;  %v1419_v42 = vadd.f32 %v966_v29, %v1311_v40  ;;  %v406_v48 = vsel %vm383_vm1, %v1408_v33, -1e+30  ;;  %v1433_v53 = vadd.f32 %v990_v37, %v1311_v40 }
  0xe1   :  { %v262_v36 = vpop.f32.mrf.mxu0  ;;  %v435_v41 = vsel %vm416_vm2, %v390_v35, -inf  ;;  %v342_v49 = vpop.f32.mrf.mxu1  ;;  %v483_v52 = vsel %vm416_vm2, %v406_v48, -inf }
  0xe2   :  { %v1422_v45 = vadd.f32 %v1311_v40, %v262_v36  ;;  %v1436_v57 = vadd.f32 %v1311_v40, %v342_v49  ;;  %v393_v58 = vsel %vm383_vm1, %v1419_v42, -1e+30  ;;  %v409_v4 = vsel %vm383_vm1, %v1433_v53, -1e+30 }
  0xe3   :  { %v969_v50 = vpop.f32.mrf.mxu0  ;;  %v993_v61 = vpop.f32.mrf.mxu1  ;;  %v444_v62 = vsel %vm416_vm2, %v393_v58, -inf  ;;  %v492_v10 = vsel %vm416_vm2, %v409_v4, -inf }
  0xe4   :  { %433 = vmax.xlane.f32.xlu1 %v432_v22  ;;  %430 = vmax.xlane.f32.xlu0 %v429_v23  ;;  %v392_v59 = vsel %vm383_vm1, %v1422_v45, -1e+30  ;;  %v1447_v0 = vadd.f32 %v969_v50, %v1311_v40  ;;  %v408_v5 = vsel %vm383_vm1, %v1436_v57, -1e+30  ;;  %v1461_v12 = vadd.f32 %v993_v61, %v1311_v40 }
  0xe5   :  { %v272_v60 = vpop.f32.mrf.mxu0  ;;  %v441_v63 = vsel %vm416_vm2, %v392_v59, -inf  ;;  %v352_v6 = vpop.f32.mrf.mxu1  ;;  %v489_v11 = vsel %vm416_vm2, %v408_v5, -inf }
  0xe6   :  { %v1450_v1 = vadd.f32 %v1311_v40, %v272_v60  ;;  %v1464_v13 = vadd.f32 %v1311_v40, %v352_v6  ;;  %v395_v16 = vsel %vm383_vm1, %v1447_v0, -1e+30  ;;  %v411_v26 = vsel %vm383_vm1, %v1461_v12, -1e+30 }
  0xe7   :  { %v972_v9 = vpop.f32.mrf.mxu0  ;;  %v996_v19 = vpop.f32.mrf.mxu1  ;;  %v450_v20 = vsel %vm416_vm2, %v395_v16, -inf }
  0xe8   :  { %481 = vmax.xlane.f32.xlu1 %v480_v30  ;;  %478 = vmax.xlane.f32.xlu0 %v477_v31  ;;  %2035 = vst [vmem:[#allocation2_spill] sm:$0xff] %v1464_v13  ;;  %v394_v17 = vsel %vm383_vm1, %v1450_v1, -1e+30  ;;  %v1475_v22 = vadd.f32 %v972_v9, %v1311_v40  ;;  %v410_v27 = vsel %vm383_vm1, %v1464_v13, -1e+30  ;;  %v498_v30 = vsel %vm416_vm2, %v411_v26, -inf }
  0xe9   :  { %v282_v18 = vpop.f32.mrf.mxu0  ;;  %v447_v21 = vsel %vm416_vm2, %v394_v17, -inf  ;;  %v362_v28 = vpop.f32.mrf.mxu1  ;;  %v495_v31 = vsel %vm416_vm2, %v410_v27, -inf  ;;  %v1489_v34 = vadd.f32 %v996_v19, %v1311_v40 }
  0xea   :  { %2036 = vst [vmem:[#allocation3_spill] sm:$0xff] %v1475_v22  ;;  %v1478_v23 = vadd.f32 %v1311_v40, %v282_v18  ;;  %v1492_v35 = vadd.f32 %v1311_v40, %v362_v28  ;;  %v397_v36 = vsel %vm383_vm1, %v1475_v22, -1e+30 }
  0xeb   :  { %v975_v29 = vpop.f32.mrf.mxu0  ;;  %2038 = vst [vmem:[#allocation5_spill] sm:$0xff] %v1489_v34  ;;  %v456_v46 = vsel %vm416_vm2, %v397_v36, -inf }
  0xec   :  { %439 = vmax.xlane.f32.xlu1 %v438_v38  ;;  %436 = vmax.xlane.f32.xlu0 %v435_v41  ;;  %2037 = vst [vmem:[#allocation4_spill] sm:$0xff] %v1478_v23  ;;  %2039 = vst [vmem:[#allocation6_spill] sm:$0xff] %v1492_v35  ;;  %v396_v37 = vsel %vm383_vm1, %v1478_v23, -1e+30  ;;  %v999_v41 = vpop.f32.mrf.mxu1  ;;  %v1503_v49 = vadd.f32 %v975_v29, %v1311_v40 }
  0xed   :  { %v292_v38 = vpop.f32.mrf.mxu0  ;;  %v453_v48 = vsel %vm416_vm2, %v396_v37, -inf  ;;  %v1517_v61 = vadd.f32 %v999_v41, %v1311_v40 }
  0xee   :  { %2040 = vst [vmem:[#allocation7_spill] sm:$0xff] %v1503_v49  ;;  %v1506_v50 = vadd.f32 %v1311_v40, %v292_v38  ;;  %v372_v58 = vpop.f32.mrf.mxu1 }
  0xef   :  { %2042 = vst [vmem:[#allocation9_spill] sm:$0xff] %v1517_v61  ;;  %v415_v9 = vsel %vm383_vm1, %v1517_v61, -1e+30 }
  0xf0   :  { %487 = vmax.xlane.f32.xlu1 %v486_v51  ;;  %484 = vmax.xlane.f32.xlu0 %v483_v52  ;;  %2041 = vst [vmem:[#allocation8_spill] sm:$0xff] %v1506_v50  ;;  %v413_v51 = vsel %vm383_vm1, %v1489_v34, -1e+30  ;;  %v412_v52 = vsel %vm383_vm1, %v1492_v35, -1e+30 }
  0xf1   :  { %v504_v59 = vsel %vm416_vm2, %v413_v51, -inf  ;;  %v501_v60 = vsel %vm416_vm2, %v412_v52, -inf  ;;  %v398_v4 = vsel %vm383_vm1, %v1506_v50, -1e+30 }
  0xf2   :  { %v459_v6 = vsel %vm416_vm2, %v398_v4, -inf }
  0xf4   :  { %445 = vmax.xlane.f32.xlu1 %v444_v62  ;;  %442 = vmax.xlane.f32.xlu0 %v441_v63  ;;  %v1520_v62 = vadd.f32 %v1311_v40, %v372_v58  ;;  %v399_v63 = vsel %vm383_vm1, %v1503_v49, -1e+30 }
  0xf5   :  { %v462_v5 = vsel %vm416_vm2, %v399_v63, -inf }
  0xf6   :  { %2043 = vst [vmem:[#allocation10_spill] sm:$0xff] %v1520_v62  ;;  %v414_v40 = vsel %vm383_vm1, %v1520_v62, -1e+30 }
  0xf8   :  { %493 = vmax.xlane.f32.xlu1 %v492_v10  ;;  %490 = vmax.xlane.f32.xlu0 %v489_v11  ;;  %v510_v10 = vsel %vm416_vm2, %v415_v9, -inf  ;;  %v507_v11 = vsel %vm416_vm2, %v414_v40, -inf }
  0xfc   :  { %451 = vmax.xlane.f32.xlu1 %v450_v20  ;;  %448 = vmax.xlane.f32.xlu0 %v447_v21 }
 0x100   :  { %499 = vmax.xlane.f32.xlu1 %v498_v30  ;;  %496 = vmax.xlane.f32.xlu0 %v495_v31 }
 0x104   :  { %457 = vmax.xlane.f32.xlu1 %v456_v46  ;;  %454 = vmax.xlane.f32.xlu0 %v453_v48 }
 0x108   :  { %505 = vmax.xlane.f32.xlu1 %v504_v59  ;;  %502 = vmax.xlane.f32.xlu0 %v501_v60 }
 0x10c   :  { %463 = vmax.xlane.f32.xlu1 %v462_v5  ;;  %460 = vmax.xlane.f32.xlu0 %v459_v6 }
 0x110   :  { %511 = vmax.xlane.f32.xlu1 %v510_v10  ;;  %508 = vmax.xlane.f32.xlu0 %v507_v11 }
 0x15d   :  { %v470_v16 = vpop.xlane.xlu1 %469  ;;  %v422_v17 = vpop.xlane.xlu0 %421 }
 0x15e   :  { %v530_v18 = vsub.f32 %v1318_v44, %v470_v16  ;;  %v514_v19 = vsub.f32 %v1315_v43, %v422_v17 }
 0x160   :  { %v562_v20 = vsel %vm383_vm1, %v530_v18, -1e+30  ;;  %v546_v21 = vsel %vm383_vm1, %v514_v19, -1e+30 }
 0x161   :  { %v611_v26 = vmul.f32 1.442695, %v562_v20  ;;  %v579_v27 = vmul.f32 1.442695, %v546_v21  ;;  %v428_v28 = vpop.xlane.xlu1 %427  ;;  %v419_v29 = vpop.xlane.xlu0 %418 }
 0x162   :  { %v516_v30 = vsub.f32 %v1335_v55, %v428_v28  ;;  %v513_v31 = vsub.f32 %v1321_v47, %v419_v29 }
 0x163   :  { %1012 = vpow2.f32 %v579_v27 }
 0x164   :  { %v548_v36 = vsel %vm383_vm1, %v516_v30, -1e+30  ;;  %v545_v37 = vsel %vm383_vm1, %v513_v31, -1e+30  ;;  %1014 = vpow2.f32 %v611_v26 }
 0x165   :  { %v583_v38 = vmul.f32 1.442695, %v548_v36  ;;  %v577_v41 = vmul.f32 1.442695, %v545_v37  ;;  %v476_v46 = vpop.xlane.xlu1 %475  ;;  %v467_v48 = vpop.xlane.xlu0 %466 }
 0x166   :  { %v532_v51 = vsub.f32 %v1338_v56, %v476_v46  ;;  %v529_v52 = vsub.f32 %v1332_v54, %v467_v48 }
 0x167   :  { %1016 = vpow2.f32 %v577_v41 }
 0x168   :  { %v564_v58 = vsel %vm383_vm1, %v532_v51, -1e+30  ;;  %v561_v59 = vsel %vm383_vm1, %v529_v52, -1e+30  ;;  %1018 = vpow2.f32 %v583_v38 }
 0x169   :  { %v609_v60 = vmul.f32 1.442695, %v561_v59  ;;  %v425_v63 = vpop.xlane.xlu1 %424  ;;  %v473_v4 = vpop.xlane.xlu0 %472  ;;  %v615_v5 = vmul.f32 1.442695, %v564_v58 }
 0x16a   :  { %v515_v6 = vsub.f32 %v1352_v2, %v425_v63  ;;  %v531_v9 = vsub.f32 %v1355_v3, %v473_v4 }
 0x16b   :  { %1020 = vpow2.f32 %v609_v60 }
 0x16c   :  { %v547_v40 = vsel %vm383_vm1, %v515_v6, -1e+30  ;;  %v563_v10 = vsel %vm383_vm1, %v531_v9, -1e+30  ;;  %1022 = vpow2.f32 %v615_v5 }
 0x16d   :  { %v581_v11 = vmul.f32 1.442695, %v547_v40  ;;  %v434_v16 = vpop.xlane.xlu1 %433  ;;  %v431_v17 = vpop.xlane.xlu0 %430  ;;  %v613_v18 = vmul.f32 1.442695, %v563_v10 }
 0x16e   :  { %v518_v19 = vsub.f32 %v1362_v7, %v434_v16  ;;  %v517_v20 = vsub.f32 %v1365_v8, %v431_v17 }
 0x16f   :  { %1024 = vpow2.f32 %v581_v11 }
 0x170   :  { %v550_v21 = vsel %vm383_vm1, %v518_v19, -1e+30  ;;  %v549_v26 = vsel %vm383_vm1, %v517_v20, -1e+30  ;;  %v1568_v27 = vpop.eup %1012  ;;  %1026 = vpow2.f32 %v613_v18 }
 0x171   :  { %v587_v28 = vmul.f32 1.442695, %v550_v21  ;;  %v585_v29 = vmul.f32 1.442695, %v549_v26  ;;  %v482_v30 = vpop.xlane.xlu1 %481  ;;  %v479_v31 = vpop.xlane.xlu0 %478  ;;  %v644_v41 = vsel %vm416_vm2, %v1568_v27, 0.0 }
 0x172   :  { %v1570_v36 = vpop.eup %1014  ;;  %v534_v37 = vsub.f32 %v1375_v14, %v482_v30  ;;  %v533_v38 = vsub.f32 %v1378_v15, %v479_v31  ;;  %645 = vadd.xlane.f32.xlu1 %v644_v41 }
 0x173   :  { %1028 = vpow2.f32 %v587_v28  ;;  %v692_v60 = vsel %vm416_vm2, %v1570_v36, 0.0 }
 0x174   :  { %v566_v46 = vsel %vm383_vm1, %v534_v37, -1e+30  ;;  %v565_v48 = vsel %vm383_vm1, %v533_v38, -1e+30  ;;  %v1580_v51 = vpop.eup %1016  ;;  %1030 = vpow2.f32 %v585_v29 }
 0x175   :  { %v619_v52 = vmul.f32 1.442695, %v566_v46  ;;  %v440_v58 = vpop.xlane.xlu1 %439  ;;  %v437_v59 = vpop.xlane.xlu0 %436  ;;  %v617_v4 = vmul.f32 1.442695, %v565_v48  ;;  %v641_v9 = vsel %vm416_vm2, %v1580_v51, 0.0 }
 0x176   :  { %v1584_v63 = vpop.eup %1018  ;;  %v520_v5 = vsub.f32 %v1391_v24, %v440_v58  ;;  %v519_v6 = vsub.f32 %v1394_v25, %v437_v59  ;;  %693 = vadd.xlane.f32.xlu1 %v692_v60  ;;  %642 = vadd.xlane.f32.xlu0 %v641_v9 }
 0x177   :  { %1032 = vpow2.f32 %v619_v52  ;;  %v650_v20 = vsel %vm416_vm2, %v1584_v63, 0.0 }
 0x178   :  { %v552_v40 = vsel %vm383_vm1, %v520_v5, -1e+30  ;;  %v551_v10 = vsel %vm383_vm1, %v519_v6, -1e+30  ;;  %v1594_v11 = vpop.eup %1020  ;;  %1034 = vpow2.f32 %v617_v4 }
 0x179   :  { %v591_v16 = vmul.f32 1.442695, %v552_v40  ;;  %v589_v17 = vmul.f32 1.442695, %v551_v10  ;;  %v488_v18 = vpop.xlane.xlu1 %487  ;;  %v485_v19 = vpop.xlane.xlu0 %484  ;;  %v689_v28 = vsel %vm416_vm2, %v1594_v11, 0.0 }
 0x17a   :  { %v536_v21 = vsub.f32 %v1405_v32, %v488_v18  ;;  %v535_v26 = vsub.f32 %v1408_v33, %v485_v19  ;;  %v1602_v29 = vpop.eup %1022  ;;  %651 = vadd.xlane.f32.xlu1 %v650_v20  ;;  %690 = vadd.xlane.f32.xlu0 %v689_v28 }
 0x17b   :  { %1036 = vpow2.f32 %v591_v16  ;;  %v698_v60 = vsel %vm416_vm2, %v1602_v29, 0.0 }
 0x17c   :  { %v1604_v30 = vpop.eup %1024  ;;  %v568_v31 = vsel %vm383_vm1, %v536_v21, -1e+30  ;;  %v567_v37 = vsel %vm383_vm1, %v535_v26, -1e+30  ;;  %1038 = vpow2.f32 %v589_v17 }
 0x17d   :  { %v623_v38 = vmul.f32 1.442695, %v568_v31  ;;  %v621_v41 = vmul.f32 1.442695, %v567_v37  ;;  %v446_v46 = vpop.xlane.xlu1 %445  ;;  %v443_v48 = vpop.xlane.xlu0 %442  ;;  %v647_v52 = vsel %vm416_vm2, %v1604_v30, 0.0 }
 0x17e   :  { %v522_v58 = vsub.f32 %v1419_v42, %v446_v46  ;;  %v521_v59 = vsub.f32 %v1422_v45, %v443_v48  ;;  %v1616_v4 = vpop.eup %1026  ;;  %699 = vadd.xlane.f32.xlu1 %v698_v60  ;;  %648 = vadd.xlane.f32.xlu0 %v647_v52 }
 0x17f   :  { %1040 = vpow2.f32 %v623_v38  ;;  %v695_v26 = vsel %vm416_vm2, %v1616_v4, 0.0 }
 0x180   :  { %v1618_v5 = vpop.eup %1028  ;;  %v554_v6 = vsel %vm383_vm1, %v522_v58, -1e+30  ;;  %v553_v9 = vsel %vm383_vm1, %v521_v59, -1e+30  ;;  %1042 = vpow2.f32 %v621_v41 }
 0x181   :  { %v595_v40 = vmul.f32 1.442695, %v554_v6  ;;  %v593_v10 = vmul.f32 1.442695, %v553_v9  ;;  %v494_v16 = vpop.xlane.xlu1 %493  ;;  %v491_v17 = vpop.xlane.xlu0 %490  ;;  %v656_v18 = vsel %vm416_vm2, %v1618_v5, 0.0 }
 0x182   :  { %v1626_v19 = vpop.eup %1030  ;;  %v538_v20 = vsub.f32 %v1433_v53, %v494_v16  ;;  %v537_v21 = vsub.f32 %v1436_v57, %v491_v17  ;;  %657 = vadd.xlane.f32.xlu1 %v656_v18  ;;  %696 = vadd.xlane.f32.xlu0 %v695_v26 }
 0x183   :  { %1044 = vpow2.f32 %v595_v40  ;;  %v653_v60 = vsel %vm416_vm2, %v1626_v19, 0.0 }
 0x184   :  { %v1632_v28 = vpop.eup %1032  ;;  %v570_v31 = vsel %vm383_vm1, %v538_v20, -1e+30  ;;  %v569_v37 = vsel %vm383_vm1, %v537_v21, -1e+30  ;;  %1046 = vpow2.f32 %v593_v10 }
 0x185   :  { %v627_v38 = vmul.f32 1.442695, %v570_v31  ;;  %v625_v41 = vmul.f32 1.442695, %v569_v37  ;;  %v452_v46 = vpop.xlane.xlu1 %451  ;;  %v449_v48 = vpop.xlane.xlu0 %448  ;;  %v704_v52 = vsel %vm416_vm2, %v1632_v28, 0.0 }
 0x186   :  { %v524_v58 = vsub.f32 %v1447_v0, %v452_v46  ;;  %v523_v59 = vsub.f32 %v1450_v1, %v449_v48  ;;  %v1644_v6 = vpop.eup %1034  ;;  %705 = vadd.xlane.f32.xlu1 %v704_v52  ;;  %654 = vadd.xlane.f32.xlu0 %v653_v60 }
 0x187   :  { %1048 = vpow2.f32 %v627_v38  ;;  %v701_v38 = vsel %vm416_vm2, %v1644_v6, 0.0 }
 0x188   :  { %v1646_v9 = vpop.eup %1036  ;;  %v556_v40 = vsel %vm383_vm1, %v524_v58, -1e+30  ;;  %v555_v10 = vsel %vm383_vm1, %v523_v59, -1e+30  ;;  %1050 = vpow2.f32 %v625_v41 }
 0x189   :  { %v599_v16 = vmul.f32 1.442695, %v556_v40  ;;  %v500_v17 = vpop.xlane.xlu1 %499  ;;  %v497_v18 = vpop.xlane.xlu0 %496  ;;  %v662_v20 = vsel %vm416_vm2, %v1646_v9, 0.0  ;;  %v597_v26 = vmul.f32 1.442695, %v555_v10 }
 0x18a   :  { %v1654_v21 = vpop.eup %1038  ;;  %v540_v31 = vsub.f32 %v1461_v12, %v500_v17  ;;  %v539_v37 = vsub.f32 %v1464_v13, %v497_v18  ;;  %663 = vadd.xlane.f32.xlu1 %v662_v20  ;;  %702 = vadd.xlane.f32.xlu0 %v701_v38 }
 0x18b   :  { %1052 = vpow2.f32 %v599_v16  ;;  %v659_v40 = vsel %vm416_vm2, %v1654_v21, 0.0 }
 0x18c   :  { %v1660_v41 = vpop.eup %1040  ;;  %v572_v46 = vsel %vm383_vm1, %v540_v31, -1e+30  ;;  %v571_v48 = vsel %vm383_vm1, %v539_v37, -1e+30  ;;  %1054 = vpow2.f32 %v597_v26 }
 0x18d   :  { %v631_v52 = vmul.f32 1.442695, %v572_v46  ;;  %v458_v58 = vpop.xlane.xlu1 %457  ;;  %v455_v59 = vpop.xlane.xlu0 %454  ;;  %v710_v60 = vsel %vm416_vm2, %v1660_v41, 0.0  ;;  %v629_v16 = vmul.f32 1.442695, %v571_v48 }
 0x18e   :  { %v1670_v10 = vpop.eup %1042  ;;  %v526_v17 = vsub.f32 %v1475_v22, %v458_v58  ;;  %v525_v18 = vsub.f32 %v1478_v23, %v455_v59  ;;  %711 = vadd.xlane.f32.xlu1 %v710_v60  ;;  %660 = vadd.xlane.f32.xlu0 %v659_v40 }
 0x18f   :  { %1056 = vpow2.f32 %v631_v52  ;;  %v707_v48 = vsel %vm416_vm2, %v1670_v10, 0.0 }
 0x190   :  { %v1674_v20 = vpop.eup %1044  ;;  %v558_v31 = vsel %vm383_vm1, %v526_v17, -1e+30  ;;  %v557_v37 = vsel %vm383_vm1, %v525_v18, -1e+30  ;;  %1058 = vpow2.f32 %v629_v16 }
 0x191   :  { %v603_v38 = vmul.f32 1.442695, %v558_v31  ;;  %v506_v46 = vpop.xlane.xlu1 %505  ;;  %v503_v13 = vpop.xlane.xlu0 %502  ;;  %v668_v26 = vsel %vm416_vm2, %v1674_v20, 0.0  ;;  %v601_v58 = vmul.f32 1.442695, %v557_v37 }
 0x192   :  { %v1684_v52 = vpop.eup %1046  ;;  %v542_v59 = vsub.f32 %v1489_v34, %v506_v46  ;;  %v541_v60 = vsub.f32 %v1492_v35, %v503_v13  ;;  %669 = vadd.xlane.f32.xlu1 %v668_v26  ;;  %708 = vadd.xlane.f32.xlu0 %v707_v48 }
 0x193   :  { %1060 = vpow2.f32 %v603_v38  ;;  %v665_v13 = vsel %vm416_vm2, %v1684_v52, 0.0 }
 0x194   :  { %v1688_v40 = vpop.eup %1048  ;;  %v574_v17 = vsel %vm383_vm1, %v542_v59, -1e+30  ;;  %v573_v18 = vsel %vm383_vm1, %v541_v60, -1e+30  ;;  %1062 = vpow2.f32 %v601_v58 }
 0x195   :  { %v635_v31 = vmul.f32 1.442695, %v574_v17  ;;  %v464_v23 = vpop.xlane.xlu1 %463  ;;  %v461_v22 = vpop.xlane.xlu0 %460  ;;  %v716_v16 = vsel %vm416_vm2, %v1688_v40, 0.0  ;;  %v633_v38 = vmul.f32 1.442695, %v573_v18 }
 0x196   :  { %v1698_v37 = vpop.eup %1050  ;;  %v528_v46 = vsub.f32 %v1503_v49, %v464_v23  ;;  %v527_v26 = vsub.f32 %v1506_v50, %v461_v22  ;;  %717 = vadd.xlane.f32.xlu1 %v716_v16  ;;  %666 = vadd.xlane.f32.xlu0 %v665_v13 }
 0x197   :  { %1064 = vpow2.f32 %v635_v31  ;;  %v713_v22 = vsel %vm416_vm2, %v1698_v37, 0.0 }
 0x198   :  { %v1702_v48 = vpop.eup %1052  ;;  %v560_v59 = vsel %vm383_vm1, %v528_v46, -1e+30  ;;  %v559_v60 = vsel %vm383_vm1, %v527_v26, -1e+30  ;;  %1066 = vpow2.f32 %v633_v38 }
 0x199   :  { %v607_v17 = vmul.f32 1.442695, %v560_v59  ;;  %v512_v35 = vpop.xlane.xlu1 %511  ;;  %v509_v34 = vpop.xlane.xlu0 %508  ;;  %v674_v58 = vsel %vm416_vm2, %v1702_v48, 0.0  ;;  %v605_v23 = vmul.f32 1.442695, %v559_v60 }
 0x19a   :  { %v544_v18 = vsub.f32 %v1517_v61, %v512_v35  ;;  %v543_v31 = vsub.f32 %v1520_v62, %v509_v34  ;;  %v1714_v16 = vpop.eup %1054  ;;  %675 = vadd.xlane.f32.xlu1 %v674_v58  ;;  %714 = vadd.xlane.f32.xlu0 %v713_v22 }
 0x19b   :  { %1068 = vpow2.f32 %v607_v17  ;;  %v671_v34 = vsel %vm416_vm2, %v1714_v16, 0.0 }
 0x19c   :  { %v1716_v13 = vpop.eup %1056  ;;  %v576_v46 = vsel %vm383_vm1, %v544_v18, -1e+30  ;;  %v575_v26 = vsel %vm383_vm1, %v543_v31, -1e+30  ;;  %1070 = vpow2.f32 %v605_v23 }
 0x19d   :  { %v639_v59 = vmul.f32 1.442695, %v576_v46  ;;  %v722_v38 = vsel %vm416_vm2, %v1716_v13, 0.0  ;;  %v637_v35 = vmul.f32 1.442695, %v575_v26  ;;  %v1726_v60 = vpop.eup %1058 }
 0x19e   :  { %723 = vadd.xlane.f32.xlu1 %v722_v38  ;;  %672 = vadd.xlane.f32.xlu0 %v671_v34  ;;  %v719_v22 = vsel %vm416_vm2, %v1726_v60, 0.0 }
 0x19f   :  { %1072 = vpow2.f32 %v639_v59 }
 0x1a0   :  { %v1728_v17 = vpop.eup %1060  ;;  %1074 = vpow2.f32 %v637_v35 }
 0x1a1   :  { %v680_v58 = vsel %vm416_vm2, %v1728_v17, 0.0  ;;  %v1734_v18 = vpop.eup %1062 }
 0x1a2   :  { %681 = vadd.xlane.f32.xlu1 %v680_v58  ;;  %720 = vadd.xlane.f32.xlu0 %v719_v22  ;;  %v677_v46 = vsel %vm416_vm2, %v1734_v18, 0.0 }
 0x1a4   :  { %v1736_v23 = vpop.eup %1064 }
 0x1a5   :  { %v728_v31 = vsel %vm416_vm2, %v1736_v23, 0.0  ;;  %v1742_v26 = vpop.eup %1066 }
 0x1a6   :  { %2044 = vst [vmem:[#allocation11_spill] sm:$0xff] %v1742_v26  ;;  %729 = vadd.xlane.f32.xlu1 %v728_v31  ;;  %678 = vadd.xlane.f32.xlu0 %v677_v46  ;;  %v725_v35 = vsel %vm416_vm2, %v1742_v26, 0.0 }
 0x1a8   :  { %v1744_v59 = vpop.eup %1068 }
 0x1a9   :  { %v686_v38 = vsel %vm416_vm2, %v1744_v59, 0.0  ;;  %v1750_v34 = vpop.eup %1070 }
 0x1aa   :  { %2045 = vst [vmem:[#allocation12_spill] sm:$0xff] %v1750_v34  ;;  %687 = vadd.xlane.f32.xlu1 %v686_v38  ;;  %726 = vadd.xlane.f32.xlu0 %v725_v35  ;;  %v683_v31 = vsel %vm416_vm2, %v1750_v34, 0.0 }
 0x1ac   :  { %v1752_v58 = vpop.eup %1072 }
 0x1ad   :  { %2046 = vst [vmem:[#allocation13_spill] sm:$0xff] %v1752_v58  ;;  %v734_v22 = vsel %vm416_vm2, %v1752_v58, 0.0  ;;  %v1758_v46 = vpop.eup %1074 }
 0x1ae   :  { %2047 = vst [vmem:[#allocation14_spill] sm:$0xff] %v1758_v46  ;;  %735 = vadd.xlane.f32.xlu1 %v734_v22  ;;  %684 = vadd.xlane.f32.xlu0 %v683_v31  ;;  %v731_v62 = vsel %vm416_vm2, %v1758_v46, 0.0 }
 0x1b2   :  { %732 = vadd.xlane.f32.xlu0 %v731_v62 }
 0x1fb   :  { %v646_v50 = vpop.xlane.xlu1 %645 }
 0x1fc   :  { %1076 = vrcp.f32 %v646_v50 }
 0x1ff   :  { %v694_v38 = vpop.xlane.xlu1 %693  ;;  %v643_v35 = vpop.xlane.xlu0 %642 }
 0x200   :  { %1078 = vrcp.f32 %v694_v38 }
 0x201   :  { %1080 = vrcp.f32 %v643_v35 }
 0x203   :  { %v652_v61 = vpop.xlane.xlu1 %651  ;;  %v691_v49 = vpop.xlane.xlu0 %690 }
 0x204   :  { %1082 = vrcp.f32 %v652_v61 }
 0x205   :  { %1084 = vrcp.f32 %v691_v49 }
 0x207   :  { %v700_v58 = vpop.xlane.xlu1 %699  ;;  %v649_v34 = vpop.xlane.xlu0 %648 }
 0x208   :  { %1086 = vrcp.f32 %v700_v58 }
 0x209   :  { %v1077_v26 = vpop.eup %1076  ;;  %1088 = vrcp.f32 %v649_v34 }
 0x20a   :  { %v770_v22 = vmul.f32 %v1077_v26, %v1568_v27 }
 0x20b   :  { %v658_v31 = vpop.xlane.xlu1 %657  ;;  %v697_v46 = vpop.xlane.xlu0 %696 }
 0x20c   :  { %v802_v50 = vsel %vm383_vm1, %v770_v22, %v1315_v43  ;;  %1090 = vrcp.f32 %v658_v31 }
 0x20d   :  { %v1079_v62 = vpop.eup %1078  ;;  %834 = vst.msk [vmem:[%s2021_s3 + $0x8] sm:$0xff] %vm416_vm2, %v802_v50  ;;  %1092 = vrcp.f32 %v697_v46 }
 0x20e   :  { %v1081_v49 = vpop.eup %1080  ;;  %v786_v61 = vmul.f32 %v1079_v62, %v1570_v36 }
 0x20f   :  { %v769_v34 = vmul.f32 %v1081_v49, %v1580_v51  ;;  %v706_v27 = vpop.xlane.xlu1 %705  ;;  %v655_v26 = vpop.xlane.xlu0 %654 }
 0x210   :  { %v818_v58 = vsel %vm383_vm1, %v786_v61, %v1318_v44  ;;  %1094 = vrcp.f32 %v706_v27 }
 0x211   :  { %v1083_v43 = vpop.eup %1082  ;;  %850 = vst.msk [vmem:[%s2021_s3 + $0x88] sm:$0xff] %vm416_vm2, %v818_v58  ;;  %v801_v46 = vsel %vm383_vm1, %v769_v34, %v1321_v47  ;;  %1096 = vrcp.f32 %v655_v26 }
 0x212   :  { %v1085_v36 = vpop.eup %1084  ;;  %833 = vst.msk [vmem:[%s2021_s3] sm:$0xff] %vm416_vm2, %v801_v46  ;;  %v772_v44 = vmul.f32 %v1083_v43, %v1584_v63 }
 0x213   :  { %v785_v51 = vmul.f32 %v1085_v36, %v1594_v11  ;;  %v664_v38 = vpop.xlane.xlu1 %663  ;;  %v703_v35 = vpop.xlane.xlu0 %702 }
 0x214   :  { %v804_v22 = vsel %vm383_vm1, %v772_v44, %v1335_v55  ;;  %1098 = vrcp.f32 %v664_v38 }
 0x215   :  { %v1087_v31 = vpop.eup %1086  ;;  %836 = vst.msk [vmem:[%s2021_s3 + $0x18] sm:$0xff] %vm416_vm2, %v804_v22  ;;  %v817_v47 = vsel %vm383_vm1, %v785_v51, %v1332_v54  ;;  %1100 = vrcp.f32 %v703_v35 }
 0x216   :  { %v1089_v63 = vpop.eup %1088  ;;  %849 = vst.msk [vmem:[%s2021_s3 + $0x80] sm:$0xff] %vm416_vm2, %v817_v47  ;;  %v788_v55 = vmul.f32 %v1087_v31, %v1602_v29 }
 0x217   :  { %v771_v11 = vmul.f32 %v1089_v63, %v1604_v30  ;;  %v712_v50 = vpop.xlane.xlu1 %711  ;;  %v661_v62 = vpop.xlane.xlu0 %660 }
 0x218   :  { %v820_v49 = vsel %vm383_vm1, %v788_v55, %v1338_v56  ;;  %1102 = vrcp.f32 %v712_v50 }
 0x219   :  { %v1091_v61 = vpop.eup %1090  ;;  %852 = vst.msk [vmem:[%s2021_s3 + $0x98] sm:$0xff] %vm416_vm2, %v820_v49  ;;  %v803_v54 = vsel %vm383_vm1, %v771_v11, %v1352_v2  ;;  %1104 = vrcp.f32 %v661_v62 }
 0x21a   :  { %v1093_v29 = vpop.eup %1092  ;;  %835 = vst.msk [vmem:[%s2021_s3 + $0x10] sm:$0xff] %vm416_vm2, %v803_v54  ;;  %v774_v56 = vmul.f32 %v1091_v61, %v1618_v5 }
 0x21b   :  { %v787_v30 = vmul.f32 %v1093_v29, %v1616_v4  ;;  %v670_v34 = vpop.xlane.xlu1 %669  ;;  %v709_v27 = vpop.xlane.xlu0 %708 }
 0x21c   :  { %v806_v26 = vsel %vm383_vm1, %v774_v56, %v1362_v7  ;;  %1106 = vrcp.f32 %v670_v34 }
 0x21d   :  { %v1095_v58 = vpop.eup %1094  ;;  %838 = vst.msk [vmem:[%s2021_s3 + $0x28] sm:$0xff] %vm416_vm2, %v806_v26  ;;  %v819_v2 = vsel %vm383_vm1, %v787_v30, %v1355_v3  ;;  %1108 = vrcp.f32 %v709_v27 }
 0x21e   :  { %v1097_v5 = vpop.eup %1096  ;;  %851 = vst.msk [vmem:[%s2021_s3 + $0x90] sm:$0xff] %vm416_vm2, %v819_v2  ;;  %v790_v7 = vmul.f32 %v1095_v58, %v1632_v28 }
 0x21f   :  { %v773_v4 = vmul.f32 %v1097_v5, %v1626_v19  ;;  %v718_v43 = vpop.xlane.xlu1 %717  ;;  %v667_v46 = vpop.xlane.xlu0 %666 }
 0x220   :  { %v822_v36 = vsel %vm383_vm1, %v790_v7, %v1375_v14  ;;  %1110 = vrcp.f32 %v718_v43  ;;  %v2048_v43 = vld [vmem:[#allocation3_spill] sm:$0xff] }
 0x221   :  { %v1099_v44 = vpop.eup %1098  ;;  %854 = vst.msk [vmem:[%s2021_s3 + $0xa8] sm:$0xff] %vm416_vm2, %v822_v36  ;;  %v805_v3 = vsel %vm383_vm1, %v773_v4, %v1365_v8  ;;  %1112 = vrcp.f32 %v667_v46 }
 0x222   :  { %v1101_v28 = vpop.eup %1100  ;;  %837 = vst.msk [vmem:[%s2021_s3 + $0x20] sm:$0xff] %vm416_vm2, %v805_v3  ;;  %v776_v14 = vmul.f32 %v1099_v44, %v1646_v9 }
 0x223   :  { %v789_v19 = vmul.f32 %v1101_v28, %v1644_v6  ;;  %v676_v51 = vpop.xlane.xlu1 %675  ;;  %v715_v38 = vpop.xlane.xlu0 %714  ;;  %v2050_v28 = vld [vmem:[#allocation5_spill] sm:$0xff] }
 0x224   :  { %v808_v35 = vsel %vm383_vm1, %v776_v14, %v1391_v24  ;;  %1114 = vrcp.f32 %v676_v51  ;;  %v2051_v51 = vld [vmem:[#allocation4_spill] sm:$0xff] }
 0x225   :  { %v1103_v22 = vpop.eup %1102  ;;  %840 = vst.msk [vmem:[%s2021_s3 + $0x38] sm:$0xff] %vm416_vm2, %v808_v35  ;;  %v821_v8 = vsel %vm383_vm1, %v789_v19, %v1378_v15  ;;  %1116 = vrcp.f32 %v715_v38 }
 0x226   :  { %v1105_v9 = vpop.eup %1104  ;;  %853 = vst.msk [vmem:[%s2021_s3 + $0xa0] sm:$0xff] %vm416_vm2, %v821_v8  ;;  %v792_v24 = vmul.f32 %v1103_v22, %v1660_v41  ;;  %v2053_v8 = vld [vmem:[#allocation7_spill] sm:$0xff] }
 0x227   :  { %v775_v6 = vmul.f32 %v1105_v9, %v1654_v21  ;;  %v724_v31 = vpop.xlane.xlu1 %723  ;;  %v673_v47 = vpop.xlane.xlu0 %672 }
 0x228   :  { %v824_v63 = vsel %vm383_vm1, %v792_v24, %v1405_v32  ;;  %1118 = vrcp.f32 %v724_v31 }
 0x229   :  { %v1107_v55 = vpop.eup %1106  ;;  %856 = vst.msk [vmem:[%s2021_s3 + $0xb8] sm:$0xff] %vm416_vm2, %v824_v63  ;;  %v807_v15 = vsel %vm383_vm1, %v775_v6, %v1394_v25  ;;  %1120 = vrcp.f32 %v673_v47  ;;  %v2054_v6 = vld [vmem:[#allocation6_spill] sm:$0xff] }
 0x22a   :  { %v1109_v41 = vpop.eup %1108  ;;  %839 = vst.msk [vmem:[%s2021_s3 + $0x30] sm:$0xff] %vm416_vm2, %v807_v15  ;;  %v778_v32 = vmul.f32 %v1107_v55, %v1674_v20  ;;  %v2056_v55 = vld [vmem:[#allocation12_spill] sm:$0xff] }
 0x22b   :  { %v791_v21 = vmul.f32 %v1109_v41, %v1670_v10  ;;  %v682_v11 = vpop.xlane.xlu1 %681  ;;  %v721_v50 = vpop.xlane.xlu0 %720  ;;  %v2057_v41 = vld [vmem:[#allocation9_spill] sm:$0xff] }
 0x22c   :  { %v810_v62 = vsel %vm383_vm1, %v778_v32, %v1419_v42  ;;  %1122 = vrcp.f32 %v682_v11  ;;  %v2058_v11 = vld [vmem:[#allocation8_spill] sm:$0xff] }
 0x22d   :  { %v1111_v49 = vpop.eup %1110  ;;  %842 = vst.msk [vmem:[%s2021_s3 + $0x48] sm:$0xff] %vm416_vm2, %v810_v62  ;;  %v823_v25 = vsel %vm383_vm1, %v791_v21, %v1408_v33  ;;  %1124 = vrcp.f32 %v721_v50  ;;  %v2059_v62 = vld [vmem:[#allocation14_spill] sm:$0xff] }
 0x22e   :  { %v1113_v20 = vpop.eup %1112  ;;  %855 = vst.msk [vmem:[%s2021_s3 + $0xb0] sm:$0xff] %vm416_vm2, %v823_v25  ;;  %v794_v42 = vmul.f32 %v1111_v49, %v1688_v40  ;;  %v2060_v25 = vld [vmem:[#allocation10_spill] sm:$0xff] }
 0x22f   :  { %v777_v10 = vmul.f32 %v1113_v20, %v1684_v52  ;;  %v730_v61 = vpop.xlane.xlu1 %729  ;;  %v679_v54 = vpop.xlane.xlu0 %678 }
 0x230   :  { %v826_v29 = vsel %vm383_vm1, %v794_v42, %v1433_v53  ;;  %1126 = vrcp.f32 %v730_v61 }
 0x231   :  { %v1115_v56 = vpop.eup %1114  ;;  %858 = vst.msk [vmem:[%s2021_s3 + $0xc8] sm:$0xff] %vm416_vm2, %v826_v29  ;;  %v809_v33 = vsel %vm383_vm1, %v777_v10, %v1422_v45  ;;  %1128 = vrcp.f32 %v679_v54 }
 0x232   :  { %v1117_v40 = vpop.eup %1116  ;;  %841 = vst.msk [vmem:[%s2021_s3 + $0x40] sm:$0xff] %vm416_vm2, %v809_v33  ;;  %v780_v53 = vmul.f32 %v1115_v56, %v1702_v48 }
 0x233   :  { %v793_v52 = vmul.f32 %v1117_v40, %v1698_v37  ;;  %v688_v30 = vpop.xlane.xlu1 %687  ;;  %v727_v34 = vpop.xlane.xlu0 %726 }
 0x234   :  { %v812_v27 = vsel %vm383_vm1, %v780_v53, %v1447_v0  ;;  %1130 = vrcp.f32 %v688_v30 }
 0x235   :  { %v1119_v26 = vpop.eup %1118  ;;  %844 = vst.msk [vmem:[%s2021_s3 + $0x58] sm:$0xff] %vm416_vm2, %v812_v27  ;;  %v825_v45 = vsel %vm383_vm1, %v793_v52, %v1436_v57  ;;  %1132 = vrcp.f32 %v727_v34 }
 0x236   :  { %v1121_v48 = vpop.eup %1120  ;;  %857 = vst.msk [vmem:[%s2021_s3 + $0xc0] sm:$0xff] %vm416_vm2, %v825_v45  ;;  %v796_v0 = vmul.f32 %v1119_v26, %v1716_v13 }
 0x237   :  { %v779_v37 = vmul.f32 %v1121_v48, %v1714_v16  ;;  %v736_v58 = vpop.xlane.xlu1 %735  ;;  %v685_v2 = vpop.xlane.xlu0 %684 }
 0x238   :  { %v828_v5 = vsel %vm383_vm1, %v796_v0, %v1461_v12  ;;  %1134 = vrcp.f32 %v736_v58 }
 0x239   :  { %v1123_v7 = vpop.eup %1122  ;;  %860 = vst.msk [vmem:[%s2021_s3 + $0xd8] sm:$0xff] %vm416_vm2, %v828_v5  ;;  %v811_v57 = vsel %vm383_vm1, %v779_v37, %v1450_v1  ;;  %1136 = vrcp.f32 %v685_v2  ;;  %v2049_v1 = vld [vmem:[#allocation2_spill] sm:$0xff] }
 0x23a   :  { %v1125_v13 = vpop.eup %1124  ;;  %843 = vst.msk [vmem:[%s2021_s3 + $0x50] sm:$0xff] %vm416_vm2, %v811_v57  ;;  %v782_v12 = vmul.f32 %v1123_v7, %v1728_v17 }
 0x23b   :  { %v795_v16 = vmul.f32 %v1125_v13, %v1726_v60  ;;  %v733_v4 = vpop.xlane.xlu0 %732 }
 0x23c   :  { %v814_v46 = vsel %vm383_vm1, %v782_v12, %v2048_v43  ;;  %1138 = vrcp.f32 %v733_v4 }
 0x23d   :  { %v1127_v36 = vpop.eup %1126  ;;  %846 = vst.msk [vmem:[%s2021_s3 + $0x68] sm:$0xff] %vm416_vm2, %v814_v46  ;;  %v827_v44 = vsel %vm383_vm1, %v795_v16, %v2049_v1 }
 0x23e   :  { %v1129_v3 = vpop.eup %1128  ;;  %859 = vst.msk [vmem:[%s2021_s3 + $0xd0] sm:$0xff] %vm416_vm2, %v827_v44  ;;  %v798_v60 = vmul.f32 %v1127_v36, %v1736_v23  ;;  %v2052_v23 = vld [vmem:[#allocation11_spill] sm:$0xff] }
 0x23f   :  { %v781_v17 = vmul.f32 %v1129_v3, %v1734_v18 }
 0x240   :  { %v830_v14 = vsel %vm383_vm1, %v798_v60, %v2050_v28 }
 0x241   :  { %v1131_v19 = vpop.eup %1130  ;;  %862 = vst.msk [vmem:[%s2021_s3 + $0xe8] sm:$0xff] %vm416_vm2, %v830_v14  ;;  %v813_v38 = vsel %vm383_vm1, %v781_v17, %v2051_v51 }
 0x242   :  { %v1133_v35 = vpop.eup %1132  ;;  %845 = vst.msk [vmem:[%s2021_s3 + $0x60] sm:$0xff] %vm416_vm2, %v813_v38  ;;  %v784_v18 = vmul.f32 %v1131_v19, %v1744_v59  ;;  %v2055_v59 = vld [vmem:[#allocation13_spill] sm:$0xff] }
 0x243   :  { %v797_v22 = vmul.f32 %v1133_v35, %v2052_v23 }
 0x244   :  { %v816_v9 = vsel %vm383_vm1, %v784_v18, %v2053_v8 }
 0x245   :  { %v1135_v24 = vpop.eup %1134  ;;  %848 = vst.msk [vmem:[%s2021_s3 + $0x78] sm:$0xff] %vm416_vm2, %v816_v9  ;;  %v829_v31 = vsel %vm383_vm1, %v797_v22, %v2054_v6 }
 0x246   :  { %v1137_v47 = vpop.eup %1136  ;;  %861 = vst.msk [vmem:[%s2021_s3 + $0xe0] sm:$0xff] %vm416_vm2, %v829_v31  ;;  %v800_v63 = vmul.f32 %v1135_v24, %v2055_v59 }
 0x247   :  { %v783_v15 = vmul.f32 %v1137_v47, %v2056_v55 }
 0x248   :  { %v832_v32 = vsel %vm383_vm1, %v800_v63, %v2057_v41 }
 0x249   :  { %v1139_v21 = vpop.eup %1138  ;;  %864 = vst.msk [vmem:[%s2021_s3 + $0xf8] sm:$0xff] %vm416_vm2, %v832_v32  ;;  %v815_v50 = vsel %vm383_vm1, %v783_v15, %v2058_v11 }
 0x24a   :  { %847 = vst.msk [vmem:[%s2021_s3 + $0x70] sm:$0xff] %vm416_vm2, %v815_v50  ;;  %v799_v49 = vmul.f32 %v1139_v21, %v2059_v62 }
 0x24c   :  { %v831_v20 = vsel %vm383_vm1, %v799_v49, %v2060_v25 }
 0x24d   :  { %863 = vst.msk [vmem:[%s2021_s3 + $0xf0] sm:$0xff] %vm416_vm2, %v831_v20 }

</bundles_post_ra>
